<compile_context>
chip_gen: v6e
topology: v6e:2x2x1
jax: 0.10.0
libtpu: 0.0.40
codegen_flags: <defaults>
</compile_context>

<pallas_src>
from functools import partial

import jax
import jax.numpy as jnp
from jax.experimental import pallas as pl
from jax.experimental.pallas import tpu as pltpu

H1 = 128            # first hidden width
H2 = 64             # second hidden width
LANE = 128          # logits are padded to a lane multiple for a dense softmax
NEG_INF = -1e30     # bias for padded logit lanes -> exp() == 0 in the softmax
TARGET_GRID_STEPS = 8   # >= 2 TCs (v7x) x double-buffer depth x slack


def actor_kernel(x_ref, w1_ref, b1_ref, w2_ref, b2_ref, w3_ref, b3_ref, probs_ref):
    """Fused MLP + softmax for one (TILE_B, obs_dim) batch tile."""
    dt = w1_ref.dtype
    # In-kernel low-precision cast of the activations (weights already cast once
    # in the wrapper).  MXU accumulates in f32; bias/ReLU/softmax stay f32.
    x = x_ref[...].astype(dt)
    h1 = jnp.dot(x, w1_ref[...], preferred_element_type=jnp.float32)
    h1 = jnp.maximum(h1 + b1_ref[...], 0.0)                          # (TILE_B, 128) f32
    h2 = jnp.dot(h1.astype(dt), w2_ref[...], preferred_element_type=jnp.float32)
    h2 = jnp.maximum(h2 + b2_ref[...], 0.0)                          # (TILE_B, 64)  f32
    logits = jnp.dot(h2.astype(dt), w3_ref[...], preferred_element_type=jnp.float32)
    logits = logits + b3_ref[...]                                    # (TILE_B, out_pad) f32
    # Numerically stable softmax over the lane-dense padded axis (padded lanes
    # carry bias NEG_INF and zero weight columns -> exp() exactly 0).
    m = jnp.max(logits, axis=-1, keepdims=True)
    e = jnp.exp(logits - m)
    denom = jnp.sum(e, axis=-1, keepdims=True)
    probs = e * pl.reciprocal(denom, approx=False)                   # exact; EUP/VPU slack
    # Compact store: only the real act_dim lanes go back to HBM.
    act_dim = probs_ref.shape[-1]
    probs_ref[...] = probs[:, :act_dim].astype(probs_ref.dtype)


def _pick_tile(batch: int, tile_b: int) -> int:
    """Batch tile: full array for tiny batches, else a multiple of 8 sublanes
    chosen so the grid has >= TARGET_GRID_STEPS steps (capped at tile_b)."""
    if batch <= 8:
        return batch
    tb = (batch // TARGET_GRID_STEPS) // 8 * 8
    return max(8, min(tile_b, tb))


@partial(jax.jit, static_argnames=("tile_b", "compute_dtype"))
def actor_forward(x, params, *, tile_b=1024, compute_dtype=jnp.bfloat16):
    """x: (B, obs_dim) float32.  Returns (probs (B, act_dim) f32, std (act_dim,) f32)."""
    w1, b1, w2, b2, w3, b3, log_std = params
    B, obs_dim = x.shape
    act_dim = w3.shape[1]
    out_pad = ((act_dim + LANE - 1) // LANE) * LANE

    # Pad only the last layer's output dim so the softmax reduction is lane-dense.
    w3p = jnp.zeros((H2, out_pad), w3.dtype).at[:, :act_dim].set(w3)
    b3p = jnp.full((1, out_pad), NEG_INF, jnp.float32).at[:, :act_dim].set(b3)

    # Weights cast once in the wrapper (VMEM-resident across all grid steps).
    # x stays f32 and is cast inside the kernel.
    w1c = w1.astype(compute_dtype)
    w2c = w2.astype(compute_dtype)
    w3c = w3p.astype(compute_dtype)

    tb = _pick_tile(B, tile_b)
    grid = (pl.cdiv(B, tb),)

    # Rough per-step VMEM footprint (double-buffered I/O tiles + f32 intermediates
    # + resident bf16 weights).  Only override the scoped-VMEM limit when we would
    # exceed the v5e 16 MiB default (large tile_b); otherwise leave defaults.
    vmem_bytes = (
        2 * tb * max(obs_dim, LANE) * 4          # x tiles (f32, lane-padded layout)
        + 2 * tb * LANE * 4                      # compact probs tiles (padded VMEM layout)
        + 4 * tb * out_pad * 4                   # h1 / logits / e / probs intermediates
        + 2 * (obs_dim * H1 + H1 * H2 + H2 * out_pad) * 2
        + 2 * (H1 + H2 + out_pad) * 4
    )
    compiler_kwargs = dict(dimension_semantics=("parallel",))
    if vmem_bytes > 12 * 1024 * 1024:
        compiler_kwargs["vmem_limit_bytes"] = min(vmem_bytes + (4 << 20), 64 << 20)

    res = lambda i: (0, 0)  # weights/biases: constant block -> loaded once, VMEM-resident
    probs = pl.pallas_call(
        actor_kernel,
        out_shape=jax.ShapeDtypeStruct((B, act_dim), jnp.float32),   # compact output
        grid=grid,
        in_specs=[
            pl.BlockSpec((tb, obs_dim), lambda i: (i, 0)),   # x batch tile (f32)
            pl.BlockSpec((obs_dim, H1), res),                # w1 (bf16)
            pl.BlockSpec((1, H1), res),                      # b1 (f32)
            pl.BlockSpec((H1, H2), res),                     # w2 (bf16)
            pl.BlockSpec((1, H2), res),                      # b2 (f32)
            pl.BlockSpec((H2, out_pad), res),                # w3 (bf16, lane-padded)
            pl.BlockSpec((1, out_pad), res),                 # b3 (f32, lane-padded, -inf)
        ],
        out_specs=pl.BlockSpec((tb, act_dim), lambda i: (i, 0)),
        compiler_params=pltpu.CompilerParams(**compiler_kwargs),
    )(x, w1c, b1, w2c, b2, w3c, b3p)

    std = jnp.exp(log_std)   # batch-independent scalar path: kept out of the kernel
    return probs, std


def init_params(key, obs_dim, act_dim):
    """Deterministic init mimicking PyTorch Linear defaults (uniform +-1/sqrt(fan_in))."""
    ks = jax.random.split(key, 6)

    def lin(kw, kb, fan_in, fan_out):
        bound = 1.0 / jnp.sqrt(fan_in)
        w = jax.random.uniform(kw, (fan_in, fan_out), jnp.float32, -bound, bound)
        b = jax.random.uniform(kb, (1, fan_out), jnp.float32, -bound, bound)
        return w, b

    w1, b1 = lin(ks[0], ks[1], obs_dim, H1)
    w2, b2 = lin(ks[2], ks[3], H1, H2)
    w3, b3 = lin(ks[4], ks[5], H2, act_dim)
    log_std = jnp.zeros((act_dim,), jnp.float32)   # nn.Parameter(torch.zeros(act_dim))
    return (w1, b1, w2, b2, w3, b3, log_std)


def actor_ref(x, params):
    """Pure-JAX f32 reference for correctness check."""
    w1, b1, w2, b2, w3, b3, log_std = params
    h1 = jnp.maximum(x @ w1 + b1, 0.0)
    h2 = jnp.maximum(h1 @ w2 + b2, 0.0)
    logits = h2 @ w3 + b3
    return jax.nn.softmax(logits, axis=-1), jnp.exp(log_std)


if __name__ == "__main__":
    key = jax.random.PRNGKey(0)
    k_param, k_x, k_x2 = jax.random.split(key, 3)

    obs_dim, act_dim, batch = 16, 8, 2
    params = init_params(k_param, obs_dim, act_dim)
    x = jax.random.normal(k_x, (batch, obs_dim), jnp.float32)

    probs, std = jax.block_until_ready(actor_forward(x, params))
    probs_r, std_r = actor_ref(x, params)
    assert probs.shape == (batch, act_dim) and std.shape == (act_dim,)
    # bf16 MXU operands -> looser tolerance vs the f32 reference; softmax itself is exact.
    assert jnp.allclose(probs, probs_r, atol=2e-2, rtol=0)
    assert jnp.allclose(jnp.sum(probs, axis=-1), 1.0, atol=1e-4)
    assert jnp.allclose(std, std_r, atol=1e-6)

    # Second (still small) check exercising a multi-step grid with a ragged last tile.
    b2_ = 100
    x2 = jax.random.normal(k_x2, (b2_, obs_dim), jnp.float32)
    probs2, _ = jax.block_until_ready(actor_forward(x2, params))
    probs2_r, _ = actor_ref(x2, params)
    assert probs2.shape == (b2_, act_dim)
    assert jnp.allclose(probs2, probs2_r, atol=2e-2, rtol=0)
    assert jnp.allclose(jnp.sum(probs2, axis=-1), 1.0, atol=1e-4)

    print("KERNEL_OK")
</pallas_src>

<mosaic_0001>
module attributes {stable_mosaic.version = 11 : i64} {
  func.func @actor_kernel(%arg0: i32, %arg1: memref<2x16xf32, #tpu.memory_space<vmem>>, %arg2: memref<16x128xbf16, #tpu.memory_space<vmem>>, %arg3: memref<1x128xf32, #tpu.memory_space<vmem>>, %arg4: memref<128x64xbf16, #tpu.memory_space<vmem>>, %arg5: memref<1x64xf32, #tpu.memory_space<vmem>>, %arg6: memref<64x128xbf16, #tpu.memory_space<vmem>>, %arg7: memref<1x128xf32, #tpu.memory_space<vmem>>, %arg8: memref<2x8xf32, #tpu.memory_space<vmem>>) attributes {dimension_semantics = [#tpu.dimension_semantics<parallel>], iteration_bounds = array<i64: 1>, scalar_prefetch = 0 : i64, scratch_operands = 0 : i64, tpu.core_type = #tpu.core_type<tc>, window_params = [{transform_indices = @transform_0, window_bounds = array<i64: 2, 16>}, {pipeline_mode = #tpu.pipeline_mode<synchronous>, transform_indices = @transform_1, window_bounds = array<i64: 16, 128>}, {pipeline_mode = #tpu.pipeline_mode<synchronous>, transform_indices = @transform_2, window_bounds = array<i64: 1, 128>}, {pipeline_mode = #tpu.pipeline_mode<synchronous>, transform_indices = @transform_3, window_bounds = array<i64: 128, 64>}, {pipeline_mode = #tpu.pipeline_mode<synchronous>, transform_indices = @transform_4, window_bounds = array<i64: 1, 64>}, {pipeline_mode = #tpu.pipeline_mode<synchronous>, transform_indices = @transform_5, window_bounds = array<i64: 64, 128>}, {pipeline_mode = #tpu.pipeline_mode<synchronous>, transform_indices = @transform_6, window_bounds = array<i64: 1, 128>}, {transform_indices = @transform_7, window_bounds = array<i64: 2, 8>}]} {
    %c0 = arith.constant 0 : index
    %c0_0 = arith.constant 0 : index
    %0 = vector.load %arg1[%c0, %c0_0] : memref<2x16xf32, #tpu.memory_space<vmem>>, vector<2x16xf32>
    %1 = arith.truncf %0 : vector<2x16xf32> to vector<2x16xbf16>
    %c0_1 = arith.constant 0 : index
    %c0_2 = arith.constant 0 : index
    %2 = vector.load %arg2[%c0_1, %c0_2] : memref<16x128xbf16, #tpu.memory_space<vmem>>, vector<16x128xbf16>
    %cst = arith.constant dense<0.000000e+00> : vector<2x128xf32>
    %3 = tpu.matmul %1, %2, %cst {dimension_numbers = #tpu.dot_dimension_numbers<[1], [0], [0], [1], [0, 0, 1, 1], [], []>} : vector<2x16xbf16>, vector<16x128xbf16>, vector<2x128xf32> -> vector<2x128xf32>
    %c0_3 = arith.constant 0 : index
    %c0_4 = arith.constant 0 : index
    %4 = vector.load %arg3[%c0_3, %c0_4] : memref<1x128xf32, #tpu.memory_space<vmem>>, vector<1x128xf32>
    %5 = vector.broadcast %4 : vector<1x128xf32> to vector<2x128xf32>
    %6 = arith.addf %3, %5 : vector<2x128xf32>
    %cst_5 = arith.constant 0.000000e+00 : f32
    %7 = vector.broadcast %cst_5 : f32 to vector<2x128xf32>
    %8 = arith.maximumf %6, %7 : vector<2x128xf32>
    %9 = arith.truncf %8 : vector<2x128xf32> to vector<2x128xbf16>
    %c0_6 = arith.constant 0 : index
    %c0_7 = arith.constant 0 : index
    %10 = vector.load %arg4[%c0_6, %c0_7] : memref<128x64xbf16, #tpu.memory_space<vmem>>, vector<128x64xbf16>
    %cst_8 = arith.constant dense<0.000000e+00> : vector<2x64xf32>
    %11 = tpu.matmul %9, %10, %cst_8 {dimension_numbers = #tpu.dot_dimension_numbers<[1], [0], [0], [1], [0, 0, 1, 1], [], []>} : vector<2x128xbf16>, vector<128x64xbf16>, vector<2x64xf32> -> vector<2x64xf32>
    %c0_9 = arith.constant 0 : index
    %c0_10 = arith.constant 0 : index
    %12 = vector.load %arg5[%c0_9, %c0_10] : memref<1x64xf32, #tpu.memory_space<vmem>>, vector<1x64xf32>
    %13 = vector.broadcast %12 : vector<1x64xf32> to vector<2x64xf32>
    %14 = arith.addf %11, %13 : vector<2x64xf32>
    %cst_11 = arith.constant 0.000000e+00 : f32
    %15 = vector.broadcast %cst_11 : f32 to vector<2x64xf32>
    %16 = arith.maximumf %14, %15 : vector<2x64xf32>
    %17 = arith.truncf %16 : vector<2x64xf32> to vector<2x64xbf16>
    %c0_12 = arith.constant 0 : index
    %c0_13 = arith.constant 0 : index
    %18 = vector.load %arg6[%c0_12, %c0_13] : memref<64x128xbf16, #tpu.memory_space<vmem>>, vector<64x128xbf16>
    %cst_14 = arith.constant dense<0.000000e+00> : vector<2x128xf32>
    %19 = tpu.matmul %17, %18, %cst_14 {dimension_numbers = #tpu.dot_dimension_numbers<[1], [0], [0], [1], [0, 0, 1, 1], [], []>} : vector<2x64xbf16>, vector<64x128xbf16>, vector<2x128xf32> -> vector<2x128xf32>
    %c0_15 = arith.constant 0 : index
    %c0_16 = arith.constant 0 : index
    %20 = vector.load %arg7[%c0_15, %c0_16] : memref<1x128xf32, #tpu.memory_space<vmem>>, vector<1x128xf32>
    %21 = vector.broadcast %20 : vector<1x128xf32> to vector<2x128xf32>
    %22 = arith.addf %19, %21 : vector<2x128xf32>
    %cst_17 = arith.constant dense<0xFF800000> : vector<2xf32>
    %23 = vector.multi_reduction <maximumf>, %22, %cst_17 [1] : vector<2x128xf32> to vector<2xf32>
    %24 = vector.shape_cast %23 : vector<2xf32> to vector<2x1xf32>
    %25 = vector.broadcast %24 : vector<2x1xf32> to vector<2x128xf32>
    %26 = arith.subf %22, %25 : vector<2x128xf32>
    %27 = math.exp %26 : vector<2x128xf32>
    %cst_18 = arith.constant dense<0.000000e+00> : vector<2xf32>
    %28 = vector.multi_reduction <add>, %27, %cst_18 [1] : vector<2x128xf32> to vector<2xf32>
    %29 = vector.shape_cast %28 : vector<2xf32> to vector<2x1xf32>
    %30 = tpu.reciprocal %29 : vector<2x1xf32> -> vector<2x1xf32>
    %31 = vector.broadcast %30 : vector<2x1xf32> to vector<2x128xf32>
    %32 = arith.mulf %27, %31 : vector<2x128xf32>
    %33 = vector.extract_strided_slice %32 {offsets = [0, 0], sizes = [2, 8], strides = [1, 1]} : vector<2x128xf32> to vector<2x8xf32>
    %c0_19 = arith.constant 0 : index
    %c0_20 = arith.constant 0 : index
    %34 = vector.load %arg8[%c0_19, %c0_20] : memref<2x8xf32, #tpu.memory_space<vmem>>, vector<2x8xf32>
    tpu.vector_store %arg8[%c0_19, %c0_20], %33 {strides = array<i32>} : memref<2x8xf32, #tpu.memory_space<vmem>>, vector<2x8xf32>,
    return
  }
  func.func @transform_0(%arg0: i32) -> (i32, i32) {
    %c0_i32 = arith.constant 0 : i32
    %c0_i32_0 = arith.constant 0 : i32
    return %arg0, %c0_i32 : i32, i32
  }
  func.func @transform_1(%arg0: i32) -> (i32, i32) {
    %c0_i32 = arith.constant 0 : i32
    %c0_i32_0 = arith.constant 0 : i32
    %c0_i32_1 = arith.constant 0 : i32
    return %c0_i32, %c0_i32_0 : i32, i32
  }
  func.func @transform_2(%arg0: i32) -> (i32, i32) {
    %c0_i32 = arith.constant 0 : i32
    %c0_i32_0 = arith.constant 0 : i32
    %c0_i32_1 = arith.constant 0 : i32
    return %c0_i32, %c0_i32_0 : i32, i32
  }
  func.func @transform_3(%arg0: i32) -> (i32, i32) {
    %c0_i32 = arith.constant 0 : i32
    %c0_i32_0 = arith.constant 0 : i32
    %c0_i32_1 = arith.constant 0 : i32
    return %c0_i32, %c0_i32_0 : i32, i32
  }
  func.func @transform_4(%arg0: i32) -> (i32, i32) {
    %c0_i32 = arith.constant 0 : i32
    %c0_i32_0 = arith.constant 0 : i32
    %c0_i32_1 = arith.constant 0 : i32
    return %c0_i32, %c0_i32_0 : i32, i32
  }
  func.func @transform_5(%arg0: i32) -> (i32, i32) {
    %c0_i32 = arith.constant 0 : i32
    %c0_i32_0 = arith.constant 0 : i32
    %c0_i32_1 = arith.constant 0 : i32
    return %c0_i32, %c0_i32_0 : i32, i32
  }
  func.func @transform_6(%arg0: i32) -> (i32, i32) {
    %c0_i32 = arith.constant 0 : i32
    %c0_i32_0 = arith.constant 0 : i32
    %c0_i32_1 = arith.constant 0 : i32
    return %c0_i32, %c0_i32_0 : i32, i32
  }
  func.func @transform_7(%arg0: i32) -> (i32, i32) {
    %c0_i32 = arith.constant 0 : i32
    %c0_i32_0 = arith.constant 0 : i32
    return %arg0, %c0_i32 : i32, i32
  }
}

</mosaic_0001>

<bundles_post_ra>
// kernel: actor_forward.1
= control target key start
LH: loop header
LB: loop body
LE: loop exit
PB: predicated region body
PF: predicated region fallthrough
CT: control target
= control target key end

     0   :  { %v429_v1 = vmov 0.0   ;;  %vm430_vm0 = vmmov 0   ;;  %vm45_vm1 = vcmask 130048   ;;  %s526_s0 = inlined_call_operand.vmem [shape: f32[2,16], index: 0, kind: input, shape index: {}]   ;;  %s527_s1 = inlined_call_operand.vmem [shape: bf16[16,128], index: 1, kind: input, shape index: {}]   ;;  %s528_s2 = inlined_call_operand.vmem [shape: f32[1,128], index: 2, kind: input, shape index: {}]   ;;  %s529_s3 = inlined_call_operand.vmem [shape: bf16[128,64], index: 3, kind: input, shape index: {}]   ;;  %s530_s4 = inlined_call_operand.vmem [shape: f32[1,64], index: 4, kind: input, shape index: {}]   ;;  %s531_s5 = inlined_call_operand.vmem [shape: bf16[64,128], index: 5, kind: input, shape index: {}]   ;;  %s532_s6 = inlined_call_operand.vmem [shape: f32[1,128], index: 6, kind: input, shape index: {}]   ;;  %s533_s7 = inlined_call_operand.hbm [shape: f32[2,8], index: 7, kind: output, shape index: {}]  }
   0x1   :  { %v390_v0 = vld [vmem:[%s527_s1] sm:$0xff]   ;;  %349 = vmatprep.subr.bf16.mxu0 %v429_v1  ;;  %355 = vmatprep.subr.bf16.mxu1 %v429_v1  ;;  %v391_v4 = vld [vmem:[%s529_s3 + $0x38] sm:$0xff]   ;;  %v392_v5 = vld [vmem:[%s529_s3 + $0x30] sm:$0xff]  }
   0x2   :  { %v28_v2 = vld [vmem:[%s526_s0] sm:$0x3]  ;;  %350 = vmatpush3.bf16.msra.mxu0 %v390_v0  ;;  %351 = vmatprep.mubr.msk.bf16.mxu0 %vm430_vm0, %v429_v1  ;;  %v393_v6 = vld [vmem:[%s529_s3 + $0x28] sm:$0xff]  }
   0x3   :  { %v29_v3 = vpack.c.bf16 %v28_v2, %v28_v2  ;;  %371 = vmatprep.mubr.msk.bf16.mxu1 %vm430_vm0, %v429_v1  ;;  %375 = vmatprep.subr.bf16.mxu0 %v429_v1  ;;  %v394_v7 = vld [vmem:[%s529_s3 + $0x20] sm:$0xff]  }
   0x4   :  { %356 = vmatpush3.bf16.msra.mxu1 %v391_v4 }
   0x5   :  { %352 = vmatmul.mubr.msk.bf16.vlgmr.msra.gmra.mxu0 %vm45_vm1, %v29_v3  ;;  %357 = vmatprep.subr.bf16.mxu1 %v429_v1 }
   0x6   :  { %383 = vmatprep.mubr.msk.bf16.mxu0 %vm430_vm0, %v429_v1 }
   0x8   :  { %358 = vmatpush3.bf16.msra.mxu1 %v392_v5 }
   0x9   :  { %359 = vmatprep.subr.bf16.mxu1 %v429_v1 }
   0xc   :  { %360 = vmatpush3.bf16.msra.mxu1 %v393_v6 }
   0xd   :  { %12 = vsyncpa [#allocation3], 0  ;;  %361 = vmatprep.subr.bf16.mxu1 %v429_v1  ;;  %v395_v8 = vld [vmem:[%s529_s3 + $0x18] sm:$0xff]   ;;  %v396_v9 = vld [vmem:[%s529_s3 + $0x10] sm:$0xff]   ;;  %vm243_vm2 = vcmask 523264   ;;  %vm287_vm3 = vcmask 1041408  }
   0xe   :  { %v397_v10 = vld [vmem:[%s529_s3 + $0x8] sm:$0xff]   ;;  %v398_v11 = vld [vmem:[%s529_s3] sm:$0xff]   ;;  %v399_v12 = vld [vmem:[%s531_s5 + $0x18] sm:$0xff]   ;;  %vm299_vm4 = vcmask 58368  }
   0xf   :  { %376 = vmatpush3.bf16.msra.mxu0 %v399_v12  ;;  %v400_v13 = vld [vmem:[%s531_s5 + $0x10] sm:$0xff]   ;;  %v315_v14 = vld [vmem:[%s528_s2] ss:$0 sm:$0xff]  ;;  %v401_v22 = vld [vmem:[%s531_s5 + $0x8] sm:$0xff]  }
  0x10   :  { %362 = vmatpush3.bf16.msra.mxu1 %v394_v7  ;;  %377 = vmatprep.subr.bf16.mxu0 %v429_v1  ;;  %v402_v23 = vld [vmem:[%s531_s5] sm:$0xff]  }
  0x11   :  { %363 = vmatprep.subr.bf16.mxu1 %v429_v1  ;;  %v318_v24 = vld [vmem:[%s530_s4] ss:$0 sm:$0xff]  ;;  %s431_s4 = smov [#allocation2]  }
  0x12   :  { %v327_v32 = vld [vmem:[%s532_s6] ss:$0 sm:$0xff]  ;;  %s307_s5 = sshll.u32 %s431_s4, 4  ;;  %s308_s5 = int_to_ptr.vmem [resolvable:$true] %s307_s5 }
  0x13   :  { %378 = vmatpush3.bf16.msra.mxu0 %v400_v13  ;;  %s407_s6 = scalar_lea.vmem %s308_s5, 32  ;;  %p412_p1 = scmp.lt.s32.totalorder %s308_s5, %s308_s5 }
  0x14   :  { %364 = vmatpush3.bf16.msra.mxu1 %v395_v8  ;;  %379 = vmatprep.subr.bf16.mxu0 %v429_v1  ;;  %p408_p0 = scmp.ne.s32.totalorder %s308_s5, %s407_s6  ;;  %p413_p2 = scmp.lt.s32.totalorder %s407_s6, %s407_s6 }
  0x15   :  { %365 = vmatprep.subr.bf16.mxu1 %v429_v1 }
  0x16   :  { %p414_p3 = por %p413_p2, %p412_p1 }
  0x17   :  { %380 = vmatpush3.bf16.msra.mxu0 %v401_v22 }
  0x18   :  { %366 = vmatpush3.bf16.msra.mxu1 %v396_v9  ;;  %381 = vmatprep.subr.bf16.mxu0 %v429_v1  ;;  %p415_p4 = pnand %p414_p3, %p408_p0 }
  0x19   :  { %367 = vmatprep.subr.bf16.mxu1 %v429_v1 }
  0x1b   :  { %382 = vmatpush3.bf16.msra.mxu0 %v402_v23 }
  0x1c   :  { %368 = vmatpush3.bf16.msra.mxu1 %v397_v10 }
  0x1d   :  { %369 = vmatprep.subr.bf16.mxu1 %v429_v1 }
  0x20   :  { %370 = vmatpush3.bf16.msra.mxu1 %v398_v11 }
  0xc5   :  { %v83_v15 = vpop.f32.mrf.mxu0 }
  0xc6   :  { %v84_v16 = vadd.f32 %v315_v14, %v83_v15 }
  0xc7   :  { %v353_v17 = vpop.f32.mrf.mxu0 }
  0xc8   :  { %v89_v18 = vmax.f32 %v84_v16, 0.0 }
  0xc9   :  { %v86_v19 = vpop.f32.mrf.mxu0 }
  0xca   :  { %v90_v20 = vpack.c.bf16 %v89_v18, %v89_v18 }
  0xcb   :  { %v354_v21 = vpop.f32.mrf.mxu0 }
  0xcc   :  { %372 = vmatmul.mubr.bf16.vlgmr.msra.gmra.mxu1 %v90_v20 }
 0x18c   :  { %v196_v25 = vpop.f32.mrf.mxu1 }
 0x18d   :  { %v197_v26 = vadd.f32 %v318_v24, %v196_v25 }
 0x18e   :  { %v373_v27 = vpop.f32.mrf.mxu1 }
 0x18f   :  { %v202_v28 = vmax.f32 %v197_v26, 0.0 }
 0x190   :  { %v199_v29 = vpop.f32.mrf.mxu1 }
 0x191   :  { %v203_v30 = vpack.c.bf16 %v202_v28, %v202_v28 }
 0x192   :  { %v374_v31 = vpop.f32.mrf.mxu1 }
 0x193   :  { %384 = vmatmul.mubr.msk.bf16.vlgmr.msra.gmra.mxu0 %vm243_vm2, %v203_v30 }
 0x253   :  { %v281_v33 = vpop.f32.mrf.mxu0 }
 0x254   :  { %v282_v34 = vadd.f32 %v327_v32, %v281_v33 }
 0x255   :  { %v385_v35 = vpop.f32.mrf.mxu0 }
 0x256   :  { %v288_v36 = vsel %vm287_vm3, %v282_v34, -inf }
 0x257   :  { %289 = vmax.xlane.f32.xlu0 %v288_v36  ;;  %v284_v37 = vpop.f32.mrf.mxu0 }
 0x259   :  { %v386_v38 = vpop.f32.mrf.mxu0 }
 0x2e0   :  { %v290_v39 = vpop.xlane.xlu0 %289 }
 0x2e1   :  { %v291_v40 = vsub.f32 %v282_v34, %v290_v39 }
 0x2e3   :  { %v292_v41 = vmul.f32 1.442695, %v291_v40 }
 0x2e5   :  { %403 = vpow2.f32 %v292_v41 }
 0x2f2   :  { %v404_v42 = vpop.eup %403 }
 0x2f3   :  { %v294_v43 = vsel %vm287_vm3, %v404_v42, 0.0 }
 0x2f4   :  { %295 = vadd.xlane.f32.xlu0 %v294_v43 }
 0x37d   :  { %v296_v44 = vpop.xlane.xlu0 %295 }
 0x37e   :  { %405 = vrcp.f32 %v296_v44 }
 0x38b   :  { %v406_v45 = vpop.eup %405 }
 0x38c   :  { %v298_v46 = vmul.f32 %v406_v45, %v404_v42 }
 0x38e   :  { %300 = vst.msk [vmem:[#allocation2] sm:$0x3] %vm299_vm4, %v298_v46 }
 0x38f   :  { %418 = shalt.err (!%p415_p4)
}
 0x390   :  { %310 = dma.vmem_to_hbm [thread:$0]  %s308_s5, 32, %s533_s7, [#allocation3]  }
 0x391   :  { %427 = dma.done.wait [#allocation3], 32  }
 0x392   :  { %428 = vsyncadd [#allocation3], 4294967264 }
 0x393   :  { %314 = vsyncpa [#allocation3], 1 }

</bundles_post_ra>
